<compile_context>
chip_gen: v7x
topology: tpu7x:2x2x1
jax: 0.10.0
libtpu: 0.0.40
codegen_flags: <defaults>
</compile_context>

<pallas_src>
import functools

import jax
import jax.numpy as jnp
from jax import lax
from jax.experimental import pallas as pl
from jax.experimental.pallas import tpu as pltpu

_LANE = 128
_SUBLANE = 8


def _round_up(x, m):
    return (x + m - 1) // m * m


def _tile_partial(feat, cent, base, num_valid, tb):
    """Masked sum((feat - cent)**2) for one (tb, Dp) tile -> (1, 1) float32."""
    diff = feat.astype(jnp.float32) - cent.astype(jnp.float32)
    per_row = jnp.sum(diff * diff, axis=1, keepdims=True)              # (tb, 1)
    # Only the last tile can contain padded rows; the mask is cheap so it is
    # applied unconditionally (avoids an if/else on the output write).
    row_ids = base + lax.broadcasted_iota(jnp.int32, (tb, 1), 0)
    valid = (row_ids < num_valid).astype(jnp.float32)                  # (tb, 1)
    return jnp.sum(per_row * valid, axis=0, keepdims=True)             # (1, 1)


def _centerloss_vmem_kernel(label_ref, feat_ref, centers_ref, out_ref, cbuf,
                            *, num_valid, tb):
    """Centers resident in VMEM; per-row gather via VMEM dynamic-slice loads."""
    t = pl.program_id(0)
    base = t * tb
    for r in range(tb):
        idx = label_ref[base + r]
        cbuf[pl.ds(r, 1), :] = centers_ref[pl.ds(idx, 1), :]
    partial = _tile_partial(feat_ref[...], cbuf[...], base, num_valid, tb)
    out_ref[...] = jnp.broadcast_to(partial, out_ref.shape)


def _centerloss_hbm_kernel(label_ref, feat_ref, centers_hbm, out_ref, cbuf, sems,
                           *, num_valid, tb):
    """Centers stay in HBM; double-buffered per-row DMA gather."""
    t = pl.program_id(0)
    n_t = pl.num_programs(0)
    base = t * tb
    sl = lax.rem(t, 2)

    def issue(tile_base, slot):
        for r in range(tb):
            pltpu.make_async_copy(
                centers_hbm.at[pl.ds(label_ref[tile_base + r], 1), :],
                cbuf.at[slot, pl.ds(r, 1), :],
                sems.at[r, slot]).start()

    @pl.when(t == 0)
    def _prime():
        issue(0, 0)

    # Prefetch tile t+1's center rows into the other slot; overlaps with the
    # wait + compute of the current tile.
    @pl.when(t + 1 < n_t)
    def _prefetch():
        issue((t + 1) * tb, 1 - sl)

    # Wait for the current slot: reconstruct the identical descriptors that
    # were started for this tile (same src slice, dst slice, semaphore).
    for r in range(tb):
        pltpu.make_async_copy(
            centers_hbm.at[pl.ds(label_ref[base + r], 1), :],
            cbuf.at[sl, pl.ds(r, 1), :],
            sems.at[r, sl]).wait()

    partial = _tile_partial(feat_ref[...], cbuf[sl], base, num_valid, tb)
    out_ref[...] = jnp.broadcast_to(partial, out_ref.shape)


@functools.partial(
    jax.jit, static_argnames=("size_average", "tile_b", "centers_in_vmem"))
def center_loss1(feat, label, centers, size_average=True, tile_b=256,
                 centers_in_vmem=None):
    """Pallas implementation of CenterLoss1.forward.

    feat:    (B, ...) float  -- flattened to (B, feat_dim)
    label:   (B,) int
    centers: (num_classes, feat_dim) float
    centers_in_vmem: None -> auto-gate on VMEM capacity; True/False to force.
    """
    batch_size = feat.shape[0]
    feat2d = feat.reshape(batch_size, -1)
    num_classes, feat_dim = centers.shape
    if feat2d.shape[1] != feat_dim:
        raise ValueError(
            "Center's dim: {0} should be equal to input feature's dim: {1}".format(
                feat_dim, feat2d.shape[1]))

    # ---- lane-dense feature dim (zero columns contribute 0 to the loss) ----
    dp = _round_up(feat_dim, _LANE)
    centers_p = centers
    if dp != feat_dim:
        feat2d = jnp.pad(feat2d, ((0, 0), (0, dp - feat_dim)))
        centers_p = jnp.pad(centers, ((0, 0), (0, dp - feat_dim)))

    # Clamp labels: avoids OOB HBM DMA / VMEM reads (PyTorch would error here).
    label_i32 = jnp.clip(label.astype(jnp.int32).reshape(batch_size),
                         0, num_classes - 1)

    feat_item = feat2d.dtype.itemsize
    cent_item = centers_p.dtype.itemsize
    centers_bytes = num_classes * dp * cent_item

    # ---- VMEM budget & path selection (v7x has 64 MiB vs 128 MiB) ----
    try:
        vmem_cap = int(pltpu.get_tpu_info().vmem_capacity_bytes)
    except Exception:
        vmem_cap = 64 << 20
    vmem_budget = (vmem_cap * 3) // 4

    b8 = _round_up(batch_size, _SUBLANE)
    est_tb = _round_up(min(int(tile_b), b8), _SUBLANE)
    pipeline_bytes = 2 * est_tb * dp * feat_item + est_tb * dp * cent_item
    auto_resident = centers_bytes + pipeline_bytes + (4 << 20) <= vmem_budget
    resident = auto_resident if centers_in_vmem is None else bool(centers_in_vmem)

    # ---- batch tiling (smaller tiles on the DMA path: the gather unrolls) ----
    tb_req = int(tile_b) if resident else min(int(tile_b), 64)
    tb = _round_up(min(tb_req, b8), _SUBLANE)
    b_pad = _round_up(batch_size, tb)
    n_tiles = b_pad // tb

    if b_pad != batch_size:
        feat2d = jnp.pad(feat2d, ((0, b_pad - batch_size), (0, 0)))
        label_i32 = jnp.pad(label_i32, (0, b_pad - batch_size))

    out_bytes = 2 * _SUBLANE * _LANE * 4
    if resident:
        needed = centers_bytes + 2 * tb * dp * feat_item + tb * dp * cent_item + out_bytes
    else:
        needed = 2 * tb * dp * feat_item + 2 * tb * dp * cent_item + out_bytes
    vmem_limit = int(min(vmem_budget, max(needed + (4 << 20), 16 << 20)))

    # Per-step partials: lane-dense (8,128) block per tile so the batch axis
    # can be sharded across TensorCores on v7x.
    out_shape = jax.ShapeDtypeStruct((n_tiles * _SUBLANE, _LANE), jnp.float32)
    out_spec = pl.BlockSpec((_SUBLANE, _LANE), lambda i, lbl: (i, 0))
    feat_spec = pl.BlockSpec((tb, dp), lambda i, lbl: (i, 0))

    if resident:
        kernel = functools.partial(_centerloss_vmem_kernel,
                                   num_valid=batch_size, tb=tb)
        grid_spec = pltpu.PrefetchScalarGridSpec(
            num_scalar_prefetch=1,
            grid=(n_tiles,),
            in_specs=[
                feat_spec,
                pl.BlockSpec((num_classes, dp), lambda i, lbl: (0, 0)),  # resident
            ],
            out_specs=out_spec,
            scratch_shapes=[pltpu.VMEM((tb, dp), centers_p.dtype)],
        )
        semantics = ("parallel",)
    else:
        kernel = functools.partial(_centerloss_hbm_kernel,
                                   num_valid=batch_size, tb=tb)
        grid_spec = pltpu.PrefetchScalarGridSpec(
            num_scalar_prefetch=1,
            grid=(n_tiles,),
            in_specs=[
                feat_spec,
                pl.BlockSpec(memory_space=pl.ANY),                       # HBM centers
            ],
            out_specs=out_spec,
            scratch_shapes=[
                pltpu.VMEM((2, tb, dp), centers_p.dtype),                # 2 gather slots
                pltpu.SemaphoreType.DMA((tb, 2)),
            ],
        )
        semantics = ("arbitrary",)   # pipeline state carried across steps

    out = pl.pallas_call(
        kernel,
        out_shape=out_shape,
        grid_spec=grid_spec,
        compiler_params=pltpu.CompilerParams(
            dimension_semantics=semantics,
            vmem_limit_bytes=vmem_limit,
        ),
    )(label_i32, feat2d, centers_p)

    partials = out.reshape(n_tiles, _SUBLANE, _LANE)[:, 0, 0]           # (n_tiles,)
    scale = jnp.float32(0.5 / batch_size if size_average else 0.5)
    return jnp.clip(jnp.sum(partials) * scale, 1e-12, 1e12)


# TODO(synk): only the forward pass is implemented; CenterlossFunc.backward
# (the custom gradient for feat and centers) is not translated.


def _reference(feat, label, centers, size_average=True):
    batch_size = feat.shape[0]
    feat2d = feat.reshape(batch_size, -1).astype(jnp.float32)
    centers_batch = centers.astype(jnp.float32)[label]
    bs = float(batch_size) if size_average else 1.0
    loss = jnp.sum((feat2d - centers_batch) ** 2) / 2.0 / bs
    return jnp.clip(loss, 1e-12, 1e12)


if __name__ == "__main__":
    key = jax.random.PRNGKey(0)
    k1, k2, k3, k4, k5, k6, k7, k8, k9 = jax.random.split(key, 9)

    # 1) Small test matching the module: num_classes=10, feat_dim=32, batch=2.
    centers = jax.random.normal(k1, (10, 32), dtype=jnp.float32)
    feat = jax.random.normal(k2, (2, 32), dtype=jnp.float32)
    label = jax.random.randint(k3, (2,), 0, 10, dtype=jnp.int32)
    out = jax.block_until_ready(center_loss1(feat, label, centers, size_average=True))
    ref = _reference(feat, label, centers, size_average=True)
    assert jnp.allclose(out, ref, rtol=1e-5, atol=1e-6), (out, ref)

    # 2) Resident-centers path, multiple "parallel" tiles, non-128 feat_dim,
    #    padded/masked rows, size_average=False.
    centers2 = jax.random.normal(k4, (12, 200), dtype=jnp.float32)
    feat2 = jax.random.normal(k5, (80, 200), dtype=jnp.float32)
    label2 = jax.random.randint(k6, (80,), 0, 12, dtype=jnp.int32)
    out2 = jax.block_until_ready(
        center_loss1(feat2, label2, centers2, size_average=False, tile_b=32))
    ref2 = _reference(feat2, label2, centers2, size_average=False)
    assert jnp.allclose(out2, ref2, rtol=1e-4, atol=1e-3), (out2, ref2)

    # 3) Forced HBM / double-buffered DMA-gather fallback path (2 tiles).
    centers3 = jax.random.normal(k7, (12, 64), dtype=jnp.float32)
    feat3 = jax.random.normal(k8, (100, 64), dtype=jnp.float32)
    label3 = jax.random.randint(k9, (100,), 0, 12, dtype=jnp.int32)
    out3 = jax.block_until_ready(
        center_loss1(feat3, label3, centers3, size_average=True,
                     centers_in_vmem=False))
    ref3 = _reference(feat3, label3, centers3, size_average=True)
    assert jnp.allclose(out3, ref3, rtol=1e-4, atol=1e-4), (out3, ref3)

    print("KERNEL_OK")
</pallas_src>

<mosaic_0001>
module attributes {stable_mosaic.version = 11 : i64} {
  func.func @_centerloss_vmem_kernel(%arg0: i32, %arg1: memref<8xi32, #tpu.memory_space<smem>>, %arg2: memref<8x128xf32, #tpu.memory_space<vmem>>, %arg3: memref<10x128xf32, #tpu.memory_space<vmem>>, %arg4: memref<8x128xf32, #tpu.memory_space<vmem>>, %arg5: memref<8x128xf32, #tpu.memory_space<vmem>>) attributes {dimension_semantics = [#tpu.dimension_semantics<parallel>], iteration_bounds = array<i64: 1>, scalar_prefetch = 1 : i64, scratch_operands = 1 : i64, tpu.core_type = #tpu.core_type<tc>, window_params = [{transform_indices = @transform_0, window_bounds = array<i64: 8, 128>}, {pipeline_mode = #tpu.pipeline_mode<synchronous>, transform_indices = @transform_1, window_bounds = array<i64: 10, 128>}, {transform_indices = @transform_2, window_bounds = array<i64: 8, 128>}]} {
    %c8_i32 = arith.constant 8 : i32
    %0 = arith.muli %arg0, %c8_i32 : i32
    %c0_i32 = arith.constant 0 : i32
    %1 = arith.addi %0, %c0_i32 : i32
    %2 = arith.index_cast %1 : i32 to index
    %3 = memref.load %arg1[%2] : memref<8xi32, #tpu.memory_space<smem>>
    %4 = arith.index_cast %3 : i32 to index
    %c0 = arith.constant 0 : index
    %5 = vector.load %arg3[%4, %c0] : memref<10x128xf32, #tpu.memory_space<vmem>>, vector<1x128xf32>
    %c0_0 = arith.constant 0 : index
    %c0_1 = arith.constant 0 : index
    %6 = vector.load %arg5[%c0_0, %c0_1] : memref<8x128xf32, #tpu.memory_space<vmem>>, vector<1x128xf32>
    tpu.vector_store %arg5[%c0_0, %c0_1], %5 {strides = array<i32>} : memref<8x128xf32, #tpu.memory_space<vmem>>, vector<1x128xf32>,
    %c1_i32 = arith.constant 1 : i32
    %7 = arith.addi %0, %c1_i32 : i32
    %8 = arith.index_cast %7 : i32 to index
    %9 = memref.load %arg1[%8] : memref<8xi32, #tpu.memory_space<smem>>
    %10 = arith.index_cast %9 : i32 to index
    %c0_2 = arith.constant 0 : index
    %11 = vector.load %arg3[%10, %c0_2] : memref<10x128xf32, #tpu.memory_space<vmem>>, vector<1x128xf32>
    %c1 = arith.constant 1 : index
    %c0_3 = arith.constant 0 : index
    %12 = vector.load %arg5[%c1, %c0_3] : memref<8x128xf32, #tpu.memory_space<vmem>>, vector<1x128xf32>
    tpu.vector_store %arg5[%c1, %c0_3], %11 {strides = array<i32>} : memref<8x128xf32, #tpu.memory_space<vmem>>, vector<1x128xf32>,
    %c2_i32 = arith.constant 2 : i32
    %13 = arith.addi %0, %c2_i32 : i32
    %14 = arith.index_cast %13 : i32 to index
    %15 = memref.load %arg1[%14] : memref<8xi32, #tpu.memory_space<smem>>
    %16 = arith.index_cast %15 : i32 to index
    %c0_4 = arith.constant 0 : index
    %17 = vector.load %arg3[%16, %c0_4] : memref<10x128xf32, #tpu.memory_space<vmem>>, vector<1x128xf32>
    %c2 = arith.constant 2 : index
    %c0_5 = arith.constant 0 : index
    %18 = vector.load %arg5[%c2, %c0_5] : memref<8x128xf32, #tpu.memory_space<vmem>>, vector<1x128xf32>
    tpu.vector_store %arg5[%c2, %c0_5], %17 {strides = array<i32>} : memref<8x128xf32, #tpu.memory_space<vmem>>, vector<1x128xf32>,
    %c3_i32 = arith.constant 3 : i32
    %19 = arith.addi %0, %c3_i32 : i32
    %20 = arith.index_cast %19 : i32 to index
    %21 = memref.load %arg1[%20] : memref<8xi32, #tpu.memory_space<smem>>
    %22 = arith.index_cast %21 : i32 to index
    %c0_6 = arith.constant 0 : index
    %23 = vector.load %arg3[%22, %c0_6] : memref<10x128xf32, #tpu.memory_space<vmem>>, vector<1x128xf32>
    %c3 = arith.constant 3 : index
    %c0_7 = arith.constant 0 : index
    %24 = vector.load %arg5[%c3, %c0_7] : memref<8x128xf32, #tpu.memory_space<vmem>>, vector<1x128xf32>
    tpu.vector_store %arg5[%c3, %c0_7], %23 {strides = array<i32>} : memref<8x128xf32, #tpu.memory_space<vmem>>, vector<1x128xf32>,
    %c4_i32 = arith.constant 4 : i32
    %25 = arith.addi %0, %c4_i32 : i32
    %26 = arith.index_cast %25 : i32 to index
    %27 = memref.load %arg1[%26] : memref<8xi32, #tpu.memory_space<smem>>
    %28 = arith.index_cast %27 : i32 to index
    %c0_8 = arith.constant 0 : index
    %29 = vector.load %arg3[%28, %c0_8] : memref<10x128xf32, #tpu.memory_space<vmem>>, vector<1x128xf32>
    %c4 = arith.constant 4 : index
    %c0_9 = arith.constant 0 : index
    %30 = vector.load %arg5[%c4, %c0_9] : memref<8x128xf32, #tpu.memory_space<vmem>>, vector<1x128xf32>
    tpu.vector_store %arg5[%c4, %c0_9], %29 {strides = array<i32>} : memref<8x128xf32, #tpu.memory_space<vmem>>, vector<1x128xf32>,
    %c5_i32 = arith.constant 5 : i32
    %31 = arith.addi %0, %c5_i32 : i32
    %32 = arith.index_cast %31 : i32 to index
    %33 = memref.load %arg1[%32] : memref<8xi32, #tpu.memory_space<smem>>
    %34 = arith.index_cast %33 : i32 to index
    %c0_10 = arith.constant 0 : index
    %35 = vector.load %arg3[%34, %c0_10] : memref<10x128xf32, #tpu.memory_space<vmem>>, vector<1x128xf32>
    %c5 = arith.constant 5 : index
    %c0_11 = arith.constant 0 : index
    %36 = vector.load %arg5[%c5, %c0_11] : memref<8x128xf32, #tpu.memory_space<vmem>>, vector<1x128xf32>
    tpu.vector_store %arg5[%c5, %c0_11], %35 {strides = array<i32>} : memref<8x128xf32, #tpu.memory_space<vmem>>, vector<1x128xf32>,
    %c6_i32 = arith.constant 6 : i32
    %37 = arith.addi %0, %c6_i32 : i32
    %38 = arith.index_cast %37 : i32 to index
    %39 = memref.load %arg1[%38] : memref<8xi32, #tpu.memory_space<smem>>
    %40 = arith.index_cast %39 : i32 to index
    %c0_12 = arith.constant 0 : index
    %41 = vector.load %arg3[%40, %c0_12] : memref<10x128xf32, #tpu.memory_space<vmem>>, vector<1x128xf32>
    %c6 = arith.constant 6 : index
    %c0_13 = arith.constant 0 : index
    %42 = vector.load %arg5[%c6, %c0_13] : memref<8x128xf32, #tpu.memory_space<vmem>>, vector<1x128xf32>
    tpu.vector_store %arg5[%c6, %c0_13], %41 {strides = array<i32>} : memref<8x128xf32, #tpu.memory_space<vmem>>, vector<1x128xf32>,
    %c7_i32 = arith.constant 7 : i32
    %43 = arith.addi %0, %c7_i32 : i32
    %44 = arith.index_cast %43 : i32 to index
    %45 = memref.load %arg1[%44] : memref<8xi32, #tpu.memory_space<smem>>
    %46 = arith.index_cast %45 : i32 to index
    %c0_14 = arith.constant 0 : index
    %47 = vector.load %arg3[%46, %c0_14] : memref<10x128xf32, #tpu.memory_space<vmem>>, vector<1x128xf32>
    %c7 = arith.constant 7 : index
    %c0_15 = arith.constant 0 : index
    %48 = vector.load %arg5[%c7, %c0_15] : memref<8x128xf32, #tpu.memory_space<vmem>>, vector<1x128xf32>
    tpu.vector_store %arg5[%c7, %c0_15], %47 {strides = array<i32>} : memref<8x128xf32, #tpu.memory_space<vmem>>, vector<1x128xf32>,
    %c0_16 = arith.constant 0 : index
    %c0_17 = arith.constant 0 : index
    %49 = vector.load %arg2[%c0_16, %c0_17] : memref<8x128xf32, #tpu.memory_space<vmem>>, vector<8x128xf32>
    %c0_18 = arith.constant 0 : index
    %c0_19 = arith.constant 0 : index
    %50 = vector.load %arg5[%c0_18, %c0_19] : memref<8x128xf32, #tpu.memory_space<vmem>>, vector<8x128xf32>
    %51 = arith.subf %49, %50 : vector<8x128xf32>
    %52 = arith.mulf %51, %51 : vector<8x128xf32>
    %cst = arith.constant dense<0.000000e+00> : vector<8xf32>
    %53 = vector.multi_reduction <add>, %52, %cst [1] : vector<8x128xf32> to vector<8xf32>
    %54 = vector.shape_cast %53 : vector<8xf32> to vector<8x1xf32>
    %55 = tpu.iota {dimensions = array<i32: 0>} : vector<8x1xi32>
    %56 = vector.broadcast %0 : i32 to vector<8x1xi32>
    %57 = arith.addi %56, %55 : vector<8x1xi32>
    %c2_i32_20 = arith.constant 2 : i32
    %58 = vector.broadcast %c2_i32_20 : i32 to vector<8x1xi32>
    %59 = arith.cmpi slt, %57, %58 : vector<8x1xi32>
    %60 = arith.extui %59 : vector<8x1xi1> to vector<8x1xi32>
    %61 = arith.sitofp %60 : vector<8x1xi32> to vector<8x1xf32>
    %62 = arith.mulf %54, %61 : vector<8x1xf32>
    %cst_21 = arith.constant dense<0.000000e+00> : vector<1xf32>
    %63 = vector.multi_reduction <add>, %62, %cst_21 [0] : vector<8x1xf32> to vector<1xf32>
    %64 = vector.shape_cast %63 : vector<1xf32> to vector<1x1xf32>
    %65 = vector.shape_cast %64 : vector<1x1xf32> to vector<1x1xf32>
    %66 = vector.broadcast %65 : vector<1x1xf32> to vector<8x128xf32>
    %c0_22 = arith.constant 0 : index
    %c0_23 = arith.constant 0 : index
    %67 = vector.load %arg4[%c0_22, %c0_23] : memref<8x128xf32, #tpu.memory_space<vmem>>, vector<8x128xf32>
    tpu.vector_store %arg4[%c0_22, %c0_23], %66 {strides = array<i32>} : memref<8x128xf32, #tpu.memory_space<vmem>>, vector<8x128xf32>,
    return
  }
  func.func @transform_0(%arg0: i32, %arg1: memref<8xi32, #tpu.memory_space<smem>>) -> (i32, i32) {
    %c0_i32 = arith.constant 0 : i32
    %c0_i32_0 = arith.constant 0 : i32
    return %arg0, %c0_i32 : i32, i32
  }
  func.func @transform_1(%arg0: i32, %arg1: memref<8xi32, #tpu.memory_space<smem>>) -> (i32, i32) {
    %c0_i32 = arith.constant 0 : i32
    %c0_i32_0 = arith.constant 0 : i32
    %c0_i32_1 = arith.constant 0 : i32
    return %c0_i32, %c0_i32_0 : i32, i32
  }
  func.func @transform_2(%arg0: i32, %arg1: memref<8xi32, #tpu.memory_space<smem>>) -> (i32, i32) {
    %c0_i32 = arith.constant 0 : i32
    %c0_i32_0 = arith.constant 0 : i32
    return %arg0, %c0_i32 : i32, i32
  }
}

</mosaic_0001>

<bundles_post_ra>
// kernel: center_loss1.1
= control target key start
LH: loop header
LB: loop body
LE: loop exit
PB: predicated region body
PF: predicated region fallthrough
CT: control target
= control target key end

     0   :  { %s170_s0 = inlined_call_operand.vmem [shape: s32[8], index: 0, kind: input, shape index: {}]   ;;  %s171_s1 = inlined_call_operand.vmem [shape: f32[8,128], index: 1, kind: input, shape index: {}]   ;;  %s172_s2 = inlined_call_operand.vmem [shape: f32[10,128], index: 2, kind: input, shape index: {}]   ;;  %s173_s3 = inlined_call_operand.vmem [shape: f32[8,128], index: 3, kind: output, shape index: {}]  }
   0x1   :  { %s8_s14 = sshll.u32 %s170_s0, 4  ;;  %s9_s14 = int_to_ptr.vmem [resolvable:$true] %s8_s14 }
   0x2   :  { %s101_s15 = scalar_lea.vmem %s9_s14, 16  ;;  %p106_p1 = scmp.lt.s32.totalorder %s9_s14, %s9_s14 }
   0x3   :  { %p102_p0 = scmp.ne.s32.totalorder %s9_s14, %s101_s15  ;;  %p107_p2 = scmp.lt.s32.totalorder %s101_s15, %s101_s15 }
   0x5   :  { %p108_p3 = por %p107_p2, %p106_p1 }
   0x7   :  { %p109_p4 = pnand %p108_p3, %p102_p0 }
   0x9   :  { %112 = shalt.err (!%p109_p4)  }
   0xa   :  { %s115_s16 = smov [#allocation4]  }
   0xb   :  { %11 = dma.vmem_to_smem %s9_s14, 16, %s115_s16, [#allocation3] }
   0xc   :  { %113 = dma.done.wait [#allocation3], 16 }
   0xd   :  { %114 = vsyncadd [#allocation3], 4294967280 }
   0xe   :  { %13 = sfence }
   0xf   :  { %s19_s17 = sld [smem:[#allocation4]]  ;;  %s91_s18 = sld [smem:[#allocation4 + $0x1]]  ;;  %v58_v8 = vld [vmem:[%s171_s1] sm:$0xff]  ;;  %v64_v12 = vlaneseq  ;;  %v116_v14 = vmov 0.0  }
  0x10   :  { %s92_s19 = sld [smem:[#allocation4 + $0x2]]  ;;  %s93_s20 = sld [smem:[#allocation4 + $0x3]] }
  0x11   :  { %s94_s21 = sld [smem:[#allocation4 + $0x4]]  ;;  %s95_s22 = sld [smem:[#allocation4 + $0x5]]  ;;  %v65_v13 = vshrl.u32 %v64_v12, 7 }
  0x12   :  { %s96_s0 = sld [smem:[#allocation4 + $0x6]]  ;;  %s97_s23 = sld [smem:[#allocation4 + $0x7]] }
  0x13   :  { %vm68_vm0 = vcmp.lt.s32.totalorder %v65_v13, 2 }
  0x14   :  { %v98_v15 = vsel %vm68_vm0, 1.0, %v116_v14 }
  0x15   :  { %s20_s26 = scalar_lea.vmem %s172_s2, %s19_s17  ;;  %s25_s29 = scalar_lea.vmem %s172_s2, %s91_s18 }
  0x16   :  { %v21_v0 = vld [vmem:[%s20_s26] sm:$0x1]  ;;  %s30_s5 = scalar_lea.vmem %s172_s2, %s92_s19  ;;  %s35_s8 = scalar_lea.vmem %s172_s2, %s93_s20 }
  0x17   :  { %v26_v1 = vld [vmem:[%s25_s29] sm:$0x1]  ;;  %22 = vst [vmem:[#allocation2] sm:$0x1] %v21_v0  ;;  %s40_s11 = scalar_lea.vmem %s172_s2, %s94_s21  ;;  %s45_s14 = scalar_lea.vmem %s172_s2, %s95_s22 }
  0x18   :  { %27 = vst [vmem:[#allocation2 + $0x1] sm:$0x1] %v26_v1  ;;  %v31_v2 = vld [vmem:[%s30_s5] sm:$0x1]  ;;  %s50_s17 = scalar_lea.vmem %s172_s2, %s96_s0  ;;  %s55_s20 = scalar_lea.vmem %s172_s2, %s97_s23 }
  0x19   :  { %v36_v3 = vld [vmem:[%s35_s8] sm:$0x1]  ;;  %32 = vst [vmem:[#allocation2 + $0x2] sm:$0x1] %v31_v2 }
  0x1a   :  { %37 = vst [vmem:[#allocation2 + $0x3] sm:$0x1] %v36_v3  ;;  %v41_v4 = vld [vmem:[%s40_s11] sm:$0x1] }
  0x1b   :  { %v46_v5 = vld [vmem:[%s45_s14] sm:$0x1]  ;;  %42 = vst [vmem:[#allocation2 + $0x4] sm:$0x1] %v41_v4 }
  0x1c   :  { %47 = vst [vmem:[#allocation2 + $0x5] sm:$0x1] %v46_v5  ;;  %v51_v6 = vld [vmem:[%s50_s17] sm:$0x1] }
  0x1d   :  { %v56_v7 = vld [vmem:[%s55_s20] sm:$0x1]  ;;  %52 = vst [vmem:[#allocation2 + $0x6] sm:$0x1] %v51_v6 }
  0x1e   :  { %57 = vst [vmem:[#allocation2 + $0x7] sm:$0x1] %v56_v7 }
  0x25   :  { %v59_v9 = vld [vmem:[#allocation2] sm:$0xff] }
  0x26   :  { %v60_v10 = vsub.f32 %v58_v8, %v59_v9 }
  0x28   :  { %v61_v11 = vmul.f32 %v60_v10, %v60_v10 }
  0x2a   :  { %62 = vadd.xlane.f32.xlu0 %v61_v11 }
  0xb7   :  { %v63_v16 = vpop.xlane.xlu0 %62 }
  0xb8   :  { %v71_v17 = vmul.f32 %v98_v15, %v63_v16 }
  0xba   :  { %v72_v18 = vrot.slane %v71_v17, 4 }
  0xbc   :  { %v73_v19 = vadd.f32 %v72_v18, %v71_v17 }
  0xbe   :  { %v74_v20 = vrot.slane %v73_v19, 2 }
  0xc0   :  { %v75_v21 = vadd.f32 %v74_v20, %v73_v19 }
  0xc2   :  { %v76_v22 = vrot.slane %v75_v21, 1 }
  0xc4   :  { %v77_v23 = vadd.f32 %v76_v22, %v75_v21 }
  0xc6   :  { %78 = vst [vmem:[%s173_s3] sm:$0xff] %v77_v23 }

</bundles_post_ra>
